<compile_context>
chip_gen: v7x
topology: tpu7x:2x2x1
jax: 0.10.0
libtpu: 0.0.40
codegen_flags: <defaults>
</compile_context>

<pallas_src>
import math

import jax
import jax.numpy as jnp
from jax.experimental import pallas as pl
from jax.experimental.pallas import tpu as pltpu

_LANES = 128
# 2048 x 128 f32 = 1 MiB per buffer; 3 streams x 2 buffers = 6 MiB live VMEM,
# comfortably under the scoped default on v5e (16 MiB), v6e (32 MiB) and v7x (32 MiB).
_MAX_BLOCK_ROWS = 2048


def _make_leaky_relu_kernel(slope, log_slope):
    # slope / log_slope are baked in as compile-time constants (no SMEM operand).
    def kernel(x_ref, y_ref, ljd_ref):
        x = x_ref[...]
        mask = x >= 0
        # Single compare drives both outputs.
        y_ref[...] = jnp.where(mask, x, slope * x)
        ljd_ref[...] = jnp.where(mask, jnp.zeros_like(x), jnp.full_like(x, log_slope))

    return kernel


def leaky_relu_pallas(x, negative_slope=0.01, reverse=False):
    assert negative_slope > 0, "`negative_slope` must be positive"
    slope = (1.0 / negative_slope) if reverse else negative_slope
    log_slope = math.log(slope)

    orig_shape = x.shape
    dtype = x.dtype
    n = x.size
    itemsize = jnp.dtype(dtype).itemsize
    # sublane granularity: 8 for f32, 16 for bf16, 32 for int8
    sublane = max(8, 32 // max(itemsize, 1))

    rows = pl.cdiv(n, _LANES)
    rows_sub = ((rows + sublane - 1) // sublane) * sublane
    # Small tensors: single block, no extra padding. Large tensors: fixed ~1 MiB tile.
    block_rows = min(_MAX_BLOCK_ROWS, rows_sub)
    rows_padded = ((rows + block_rows - 1) // block_rows) * block_rows
    padded = rows_padded * _LANES

    # Wrapper pad only when the flat size is ragged w.r.t. the tile; skipped entirely
    # for nicely-sized inputs (no extra HBM pass).
    x_flat = jnp.reshape(x, (-1,))
    if padded != n:
        x_flat = jnp.pad(x_flat, (0, padded - n))
    x2d = jnp.reshape(x_flat, (rows_padded, _LANES))

    grid = (rows_padded // block_rows,)
    spec = pl.BlockSpec((block_rows, _LANES), lambda i: (i, 0))

    kernel = _make_leaky_relu_kernel(slope, log_slope)

    y2d, ljd2d = pl.pallas_call(
        kernel,
        out_shape=(
            jax.ShapeDtypeStruct((rows_padded, _LANES), dtype),
            jax.ShapeDtypeStruct((rows_padded, _LANES), dtype),
        ),
        grid=grid,
        in_specs=[spec],
        out_specs=(spec, spec),
        compiler_params=pltpu.CompilerParams(
            # Row axis is embarrassingly parallel -> megacore sharding on v7x.
            dimension_semantics=("parallel",),
        ),
        cost_estimate=pl.CostEstimate(
            flops=2 * n,
            transcendentals=0,
            bytes_accessed=3 * n * itemsize,
        ),
    )(x2d)

    if padded != n:
        y = jnp.reshape(jnp.reshape(y2d, (-1,))[:n], orig_shape)
        ljd = jnp.reshape(jnp.reshape(ljd2d, (-1,))[:n], orig_shape)
    else:
        y = jnp.reshape(y2d, orig_shape)
        ljd = jnp.reshape(ljd2d, orig_shape)
    # TODO(synk): ljd could be emitted as an i8 mask (25% less HBM traffic) if the
    # consumer accepts it; kept full-dtype to preserve the module's output contract.
    return y, ljd


def _reference(x, negative_slope, reverse):
    slope = (1.0 / negative_slope) if reverse else negative_slope
    y = jnp.maximum(0.0, x) + slope * jnp.minimum(0.0, x)
    ljd = jnp.where(x >= 0.0, jnp.zeros_like(x), jnp.full_like(x, math.log(slope)))
    return y, ljd


if __name__ == "__main__":
    key = jax.random.PRNGKey(0)

    # Primary check: module-like NCHW shape, exactly lane/sublane aligned (no padding path).
    x = jax.random.normal(key, (2, 4, 16, 16), dtype=jnp.float32)
    y, ljd = leaky_relu_pallas(x, negative_slope=0.01, reverse=False)
    jax.block_until_ready((y, ljd))
    y_ref, ljd_ref = _reference(x, 0.01, False)
    assert jnp.allclose(y, y_ref, atol=1e-6), "y mismatch"
    assert jnp.allclose(ljd, ljd_ref, atol=1e-6), "ljd mismatch"

    # Ragged-size check (exercises the pad/slice fallback path) + reverse (inverse) mode.
    key2 = jax.random.fold_in(key, 1)
    x2 = jax.random.normal(key2, (3, 5, 7), dtype=jnp.float32)
    y2, ljd2 = leaky_relu_pallas(x2, negative_slope=0.01, reverse=True)
    jax.block_until_ready((y2, ljd2))
    y2_ref, ljd2_ref = _reference(x2, 0.01, True)
    assert jnp.allclose(y2, y2_ref, atol=1e-5), "y (reverse) mismatch"
    assert jnp.allclose(ljd2, ljd2_ref, atol=1e-5), "ljd (reverse) mismatch"

    # Tiled-grid check (rows > block_rows -> grid > 1, pipelined).
    key3 = jax.random.fold_in(key, 2)
    x3 = jax.random.normal(key3, (8, 16, 64, 64), dtype=jnp.float32)
    y3, ljd3 = leaky_relu_pallas(x3, negative_slope=0.2, reverse=False)
    jax.block_until_ready((y3, ljd3))
    y3_ref, ljd3_ref = _reference(x3, 0.2, False)
    assert jnp.allclose(y3, y3_ref, atol=1e-6), "y (tiled) mismatch"
    assert jnp.allclose(ljd3, ljd3_ref, atol=1e-6), "ljd (tiled) mismatch"

    print("KERNEL_OK")
</pallas_src>

<mosaic_0001>
module attributes {stable_mosaic.version = 11 : i64} {
  func.func @kernel(%arg0: i32, %arg1: memref<16x128xf32, #tpu.memory_space<vmem>>, %arg2: memref<16x128xf32, #tpu.memory_space<vmem>>, %arg3: memref<16x128xf32, #tpu.memory_space<vmem>>) attributes {dimension_semantics = [#tpu.dimension_semantics<parallel>], iteration_bounds = array<i64: 1>, scalar_prefetch = 0 : i64, scratch_operands = 0 : i64, tpu.core_type = #tpu.core_type<tc>, window_params = [{transform_indices = @transform_0, window_bounds = array<i64: 16, 128>}, {transform_indices = @transform_1, window_bounds = array<i64: 16, 128>}, {transform_indices = @transform_2, window_bounds = array<i64: 16, 128>}]} {
    %c0 = arith.constant 0 : index
    %c0_0 = arith.constant 0 : index
    %0 = vector.load %arg1[%c0, %c0_0] : memref<16x128xf32, #tpu.memory_space<vmem>>, vector<16x128xf32>
    %cst = arith.constant 0.000000e+00 : f32
    %1 = vector.broadcast %cst : f32 to vector<16x128xf32>
    %2 = arith.cmpf oge, %0, %1 : vector<16x128xf32>
    %cst_1 = arith.constant 0.00999999977 : f32
    %3 = vector.broadcast %cst_1 : f32 to vector<16x128xf32>
    %4 = arith.mulf %3, %0 : vector<16x128xf32>
    %5 = arith.select %2, %0, %4 : vector<16x128xi1>, vector<16x128xf32>
    %c0_2 = arith.constant 0 : index
    %c0_3 = arith.constant 0 : index
    %6 = vector.load %arg2[%c0_2, %c0_3] : memref<16x128xf32, #tpu.memory_space<vmem>>, vector<16x128xf32>
    tpu.vector_store %arg2[%c0_2, %c0_3], %5 {strides = array<i32>} : memref<16x128xf32, #tpu.memory_space<vmem>>, vector<16x128xf32>,
    %cst_4 = arith.constant 0.000000e+00 : f32
    %7 = vector.broadcast %cst_4 : f32 to vector<16x128xf32>
    %cst_5 = arith.constant -4.60517025 : f32
    %8 = vector.broadcast %cst_5 : f32 to vector<16x128xf32>
    %9 = arith.select %2, %7, %8 : vector<16x128xi1>, vector<16x128xf32>
    %c0_6 = arith.constant 0 : index
    %c0_7 = arith.constant 0 : index
    %10 = vector.load %arg3[%c0_6, %c0_7] : memref<16x128xf32, #tpu.memory_space<vmem>>, vector<16x128xf32>
    tpu.vector_store %arg3[%c0_6, %c0_7], %9 {strides = array<i32>} : memref<16x128xf32, #tpu.memory_space<vmem>>, vector<16x128xf32>,
    return
  }
  func.func @transform_0(%arg0: i32) -> (i32, i32) {
    %c0_i32 = arith.constant 0 : i32
    %c0_i32_0 = arith.constant 0 : i32
    return %arg0, %c0_i32 : i32, i32
  }
  func.func @transform_1(%arg0: i32) -> (i32, i32) {
    %c0_i32 = arith.constant 0 : i32
    %c0_i32_0 = arith.constant 0 : i32
    return %arg0, %c0_i32 : i32, i32
  }
  func.func @transform_2(%arg0: i32) -> (i32, i32) {
    %c0_i32 = arith.constant 0 : i32
    %c0_i32_0 = arith.constant 0 : i32
    return %arg0, %c0_i32 : i32, i32
  }
}

</mosaic_0001>

<bundles_post_ra>
// kernel: tpu_custom_call.1
= control target key start
LH: loop header
LB: loop body
LE: loop exit
PB: predicated region body
PF: predicated region fallthrough
CT: control target
= control target key end

     0   :  { %8 = vsyncpa [#allocation3], 0  ;;  %s224_s0 = inlined_call_operand.hbm [shape: f32[16,128], index: 0, kind: input, shape index: {}]   ;;  %s225_s1 = inlined_call_operand.hbm [shape: f32[16,128], index: 1, kind: output, shape index: {0}]   ;;  %s226_s2 = inlined_call_operand.hbm [shape: f32[16,128], index: 2, kind: output, shape index: {1}]  }
   0x1   :  { %9 = vsyncpa [#allocation4], 0 }
   0x2   :  { %10 = vsyncpa [#allocation7], 0  ;;  %s151_s9 = smov [#allocation2]   ;;  %s79_s13 = scalar_lea.hbm %s224_s0, 256 }
   0x3   :  { %s16_s10 = sshll.u32 %s151_s9, 4  ;;  %p80_p0 = scmp.ne.s32.totalorder %s224_s0, %s79_s13  ;;  %s17_s10 = int_to_ptr.vmem [resolvable:$true] %s16_s10 }
   0x4   :  { %p83_p1 = scmp.lt.u32.totalorder %s79_s13, %s224_s0 }
   0x6   :  { %p85_p2 = pnand %p83_p1, %p80_p0 }
   0x8   :  { %88 = shalt.err (!%p85_p2)
}
   0x9   :  { %s89_s18 = scalar_lea.vmem %s17_s10, 256  ;;  %p94_p4 = scmp.lt.s32.totalorder %s17_s10, %s17_s10 }
   0xa   :  { %p90_p3 = scmp.ne.s32.totalorder %s17_s10, %s89_s18  ;;  %p95_p5 = scmp.lt.s32.totalorder %s89_s18, %s89_s18 }
   0xc   :  { %p96_p6 = por %p95_p5, %p94_p4 }
   0xe   :  { %p97_p7 = pnand %p96_p6, %p90_p3 }
  0x10   :  { %100 = shalt.err (!%p97_p7)
}
  0x11   :  { %s152_s19 = smov 128   ;;  %s153_s20 = smov 8  }
  0x12   :  { %22 = dma.hbm_to_vmem [thread:$0]  %s224_s0, 256, %s17_s10, [#allocation3], %s152_s19, %s152_s19, %s153_s20  }
  0x13   :  { %145 = dma.done.wait [#allocation3], 256  }
  0x14   :  { %146 = vsyncadd [#allocation3], 4294967040  ;;  %s154_s23 = smov [#allocation6]   ;;  %s155_s25 = smov [#allocation5]   ;;  %v26_v0 = vld [vmem:[#allocation2] sm:$0xff]  ;;  %v27_v1 = vld [vmem:[#allocation2 + $0x8] sm:$0xff] }
  0x15   :  { %s57_s24 = sshll.u32 %s154_s23, 4  ;;  %s45_s26 = sshll.u32 %s155_s25, 4  ;;  %vm28_vm0 = vcmp.ge.f32.partialorder %v26_v0, 0.0  ;;  %v30_v2 = vmul.f32 0.01, %v26_v0  ;;  %vm29_vm1 = vcmp.ge.f32.partialorder %v27_v1, 0.0  ;;  %s58_s24 = int_to_ptr.vmem [resolvable:$true] %s57_s24  ;;  %s187_s26 = int_to_ptr.vmem [resolvable:$true] %s45_s26 }
  0x16   :  { %v31_v3 = vmul.f32 0.01, %v27_v1  ;;  %v156_v4 = vmov -4.6051702   ;;  %s101_s0 = scalar_lea.vmem %s58_s24, 256  ;;  %p106_p9 = scmp.lt.s32.totalorder %s58_s24, %s58_s24 }
  0x17   :  { %v36_v5 = vsel %vm28_vm0, 0.0, %v156_v4  ;;  %v37_v6 = vsel %vm29_vm1, 0.0, %v156_v4  ;;  %v32_v7 = vsel %vm28_vm0, %v26_v0, %v30_v2  ;;  %p102_p8 = scmp.ne.s32.totalorder %s58_s24, %s101_s0  ;;  %p107_p10 = scmp.lt.s32.totalorder %s101_s0, %s101_s0 }
  0x18   :  { %v33_v8 = vsel %vm29_vm1, %v27_v1, %v31_v3  ;;  %38 = vst [vmem:[#allocation6] sm:$0xff] %v36_v5  ;;  %39 = vst [vmem:[#allocation6 + $0x8] sm:$0xff] %v37_v6 }
  0x19   :  { %34 = vst [vmem:[#allocation5] sm:$0xff] %v32_v7  ;;  %35 = vst [vmem:[#allocation5 + $0x8] sm:$0xff] %v33_v8  ;;  %p108_p11 = por %p107_p10, %p106_p9 }
  0x1b   :  { %p109_p12 = pnand %p108_p11, %p102_p8 }
  0x1d   :  { %112 = shalt.err (!%p109_p12)
}
  0x1e   :  { %s113_s29 = scalar_lea.hbm %s226_s2, 256 }
  0x1f   :  { %p114_p13 = scmp.ne.s32.totalorder %s226_s2, %s113_s29  ;;  %p117_p0 = scmp.lt.u32.totalorder %s113_s29, %s226_s2 }
  0x21   :  { %p119_p1 = pnand %p117_p0, %p114_p13 }
  0x23   :  { %122 = shalt.err (!%p119_p1)
}
  0x24   :  { %63 = dma.vmem_to_hbm [thread:$0]  %s58_s24, 256, %s226_s2, [#allocation7], %s152_s19, %s152_s19, %s153_s20  }
  0x25   :  { %s123_s8 = scalar_lea.vmem %s187_s26, 256  ;;  %p128_p3 = scmp.lt.s32.totalorder %s187_s26, %s187_s26 }
  0x26   :  { %p124_p2 = scmp.ne.s32.totalorder %s187_s26, %s123_s8  ;;  %p129_p4 = scmp.lt.s32.totalorder %s123_s8, %s123_s8 }
  0x28   :  { %p130_p5 = por %p129_p4, %p128_p3 }
  0x2a   :  { %p131_p6 = pnand %p130_p5, %p124_p2 }
  0x2c   :  { %134 = shalt.err (!%p131_p6)
}
  0x2d   :  { %s135_s11 = scalar_lea.hbm %s225_s1, 256 }
  0x2e   :  { %p136_p7 = scmp.ne.s32.totalorder %s225_s1, %s135_s11  ;;  %p139_p8 = scmp.lt.u32.totalorder %s135_s11, %s225_s1 }
  0x30   :  { %p141_p9 = pnand %p139_p8, %p136_p7 }
  0x32   :  { %144 = shalt.err (!%p141_p9)
}
  0x33   :  { %51 = dma.vmem_to_hbm [thread:$0]  %s187_s26, 256, %s225_s1, [#allocation4], %s152_s19, %s152_s19, %s153_s20  }
  0x34   :  { %147 = dma.done.wait [#allocation4], 256  }
  0x35   :  { %148 = vsyncadd [#allocation4], 4294967040 }
  0x36   :  { %149 = dma.done.wait [#allocation7], 256  }
  0x37   :  { %150 = vsyncadd [#allocation7], 4294967040 }
  0x38   :  { %70 = vsyncpa [#allocation3], 1 }
  0x39   :  { %71 = vsyncpa [#allocation4], 1 }
  0x3a   :  { %72 = vsyncpa [#allocation7], 1 }

</bundles_post_ra>
